<compile_context>
chip_gen: v7x
topology: tpu7x:2x2x1
jax: 0.10.0
libtpu: 0.0.40
codegen_flags: <defaults>
</compile_context>

<pallas_src>
import jax
import jax.numpy as jnp
from jax import lax
from jax.experimental import pallas as pl
from jax.experimental.pallas import tpu as pltpu


def _round_up(x, m):
    return (x + m - 1) // m * m


def highway_kernel(x_ref, w_ref, b_ref, o_ref):
    """Compute one (tm, tn) output tile.

    x_ref: (tm, Dp)     input rows (full padded feature dim — needed for the
                        contraction and for the residual slice)
    w_ref: (2*tn, Dp)   fused weight tile: rows [0:tn] = Wt rows of this N-tile,
                        rows [tn:2*tn] = Wh rows (PyTorch (out,in) layout)
    b_ref: (1, 2*tn)    fused bias tile [bt_tile | bh_tile]
    o_ref: (tm, tn)     output tile
    """
    tn = o_ref.shape[1]
    n = pl.program_id(0)                        # N (feature) tile index

    x = x_ref[...]                              # keep native dtype for the MXU
    w = w_ref[...]
    b = b_ref[...].astype(jnp.float32)

    # Single fused matmul for both linear layers: x @ W_fused^T -> (tm, 2*tn)
    y = lax.dot_general(x, w, (((1,), (1,)), ((), ())),
                        preferred_element_type=jnp.float32) + b

    t = jax.nn.sigmoid(y[:, :tn])               # transform gate
    h = jnp.maximum(y[:, tn:], 0.0)             # ReLU branch

    # Residual slice of x corresponding to this N tile (lane-aligned).
    col = pl.multiple_of(n * tn, 128)
    x_res = x_ref[:, pl.ds(col, tn)].astype(jnp.float32)

    # z = t*h + (1-t)*x == x + t*(h - x)
    o_ref[...] = (x_res + t * (h - x_res)).astype(o_ref.dtype)


def highway_forward(x, wt, bt, wh, bh):
    B, D = x.shape
    itemsize = jnp.dtype(x.dtype).itemsize
    Dp = _round_up(D, 128)                      # lane-dense feature dim

    # ---- tile selection (sized so double-buffered tiles fit v7x VMEM) ----
    # N tile: double-buffered fused weight tile 2*(2*tn*Dp) bytes under ~16 MiB.
    tn = 128
    for cand in (512, 384, 256, 128):
        if cand <= Dp and Dp % cand == 0 and 4 * cand * Dp * itemsize <= (16 << 20):
            tn = cand
            break
    # M tile: double-buffered (tm, Dp) x tile under ~8 MiB.
    tm = min(256, _round_up(B, 8))
    while tm > 8 and 2 * tm * Dp * itemsize > (8 << 20):
        tm = max(8, _round_up(tm // 2, 8))

    Bp = _round_up(B, tm)
    num_m = Bp // tm
    num_n = Dp // tn

    # ---- pad to tile-friendly shapes (zero padding; sliced off at the end) ----
    x_p = jnp.pad(x, ((0, Bp - B), (0, Dp - D)))
    wt_p = jnp.pad(wt, ((0, Dp - D), (0, Dp - D)))
    wh_p = jnp.pad(wh, ((0, Dp - D), (0, Dp - D)))
    bt_p = jnp.pad(bt, (0, Dp - D))
    bh_p = jnp.pad(bh, (0, Dp - D))

    # ---- fuse the two GEMMs: interleave Wt/Wh (and biases) per N tile so each
    # grid step reads one contiguous (2*tn, Dp) weight block ----
    w_fused = jnp.concatenate(
        [wt_p.reshape(num_n, tn, Dp), wh_p.reshape(num_n, tn, Dp)], axis=1
    ).reshape(2 * Dp, Dp)
    b_fused = jnp.concatenate(
        [bt_p.reshape(num_n, tn), bh_p.reshape(num_n, tn)], axis=1
    ).reshape(1, 2 * Dp)

    # ---- VMEM budget + cost hints ----
    need = 2 * itemsize * (tm * Dp + 2 * tn * Dp + 2 * tn + tm * tn)
    vmem_limit = int(min(max(2 * need, 16 << 20), 64 << 20))

    cost = pl.CostEstimate(
        flops=4 * Bp * Dp * Dp,                       # two Dp x Dp GEMMs
        transcendentals=Bp * Dp,                      # sigmoid
        bytes_accessed=itemsize * (2 * Bp * Dp + 2 * Dp * Dp + 2 * Dp),
    )

    out_p = pl.pallas_call(
        highway_kernel,
        out_shape=jax.ShapeDtypeStruct((Bp, Dp), x.dtype),
        grid_spec=pltpu.PrefetchScalarGridSpec(
            num_scalar_prefetch=0,
            # N outer, M inner: the weight tile stays resident across the whole
            # batch sweep; x tiles stream (less re-DMA traffic than the reverse).
            grid=(num_n, num_m),
            in_specs=[
                pl.BlockSpec((tm, Dp), lambda n, m: (m, 0)),       # x rows
                pl.BlockSpec((2 * tn, Dp), lambda n, m: (n, 0)),   # fused W tile
                pl.BlockSpec((1, 2 * tn), lambda n, m: (0, n)),    # fused bias
            ],
            out_specs=pl.BlockSpec((tm, tn), lambda n, m: (m, n)),
        ),
        compiler_params=pltpu.CompilerParams(
            dimension_semantics=("parallel", "parallel"),
            vmem_limit_bytes=vmem_limit,
        ),
        cost_estimate=cost,
    )(x_p, w_fused, b_fused)

    return out_p[:B, :D]


def highway_reference(x, wt, bt, wh, bh):
    t = jax.nn.sigmoid(x @ wt.T + bt)
    h = jnp.maximum(x @ wh.T + bh, 0.0)
    return t * h + (1.0 - t) * x


def _run_case(key, B, D):
    kx, kwt, kwh = jax.random.split(key, 3)
    x = jax.random.normal(kx, (B, D), dtype=jnp.float32)
    # Deterministic init matching the module: W ~ U(-0.05, 0.05), b = 0.
    wt = jax.random.uniform(kwt, (D, D), minval=-0.05, maxval=0.05, dtype=jnp.float32)
    wh = jax.random.uniform(kwh, (D, D), minval=-0.05, maxval=0.05, dtype=jnp.float32)
    bt = jnp.zeros((D,), jnp.float32)
    bh = jnp.zeros((D,), jnp.float32)

    out = jax.block_until_ready(highway_forward(x, wt, bt, wh, bh))
    ref = highway_reference(x, wt, bt, wh, bh)
    assert out.shape == (B, D)
    assert jnp.allclose(out, ref, atol=1e-5, rtol=1e-5), f"mismatch at B={B}, D={D}"


if __name__ == "__main__":
    key = jax.random.PRNGKey(0)
    k0, k1 = jax.random.split(key)
    _run_case(k0, B=16, D=32)     # small aligned-ish case (D padded to 128)
    _run_case(k1, B=13, D=200)    # non-multiple shapes exercise the padding path
    print("KERNEL_OK")
</pallas_src>

<mosaic_0001>
module attributes {stable_mosaic.version = 11 : i64} {
  func.func @highway_kernel(%arg0: i32, %arg1: i32, %arg2: memref<16x128xf32, #tpu.memory_space<vmem>>, %arg3: memref<256x128xf32, #tpu.memory_space<vmem>>, %arg4: memref<1x256xf32, #tpu.memory_space<vmem>>, %arg5: memref<16x128xf32, #tpu.memory_space<vmem>>) attributes {dimension_semantics = [#tpu.dimension_semantics<parallel>, #tpu.dimension_semantics<parallel>], iteration_bounds = array<i64: 1, 1>, scalar_prefetch = 0 : i64, scratch_operands = 0 : i64, tpu.core_type = #tpu.core_type<tc>, window_params = [{transform_indices = @transform_0, window_bounds = array<i64: 16, 128>}, {transform_indices = @transform_1, window_bounds = array<i64: 256, 128>}, {transform_indices = @transform_2, window_bounds = array<i64: 1, 256>}, {transform_indices = @transform_3, window_bounds = array<i64: 16, 128>}]} {
    %c0 = arith.constant 0 : index
    %c0_0 = arith.constant 0 : index
    %0 = vector.load %arg2[%c0, %c0_0] : memref<16x128xf32, #tpu.memory_space<vmem>>, vector<16x128xf32>
    %c0_1 = arith.constant 0 : index
    %c0_2 = arith.constant 0 : index
    %1 = vector.load %arg3[%c0_1, %c0_2] : memref<256x128xf32, #tpu.memory_space<vmem>>, vector<256x128xf32>
    %c0_3 = arith.constant 0 : index
    %c0_4 = arith.constant 0 : index
    %2 = vector.load %arg4[%c0_3, %c0_4] : memref<1x256xf32, #tpu.memory_space<vmem>>, vector<1x256xf32>
    %cst = arith.constant dense<0.000000e+00> : vector<16x256xf32>
    %3 = tpu.matmul %0, %1, %cst {dimension_numbers = #tpu.dot_dimension_numbers<[1], [1], [0], [0], [0, 0, 1, 0], [], []>} : vector<16x128xf32>, vector<256x128xf32>, vector<16x256xf32> -> vector<16x256xf32>
    %4 = vector.broadcast %2 : vector<1x256xf32> to vector<16x256xf32>
    %5 = arith.addf %3, %4 : vector<16x256xf32>
    %6 = vector.extract_strided_slice %5 {offsets = [0, 0], sizes = [16, 128], strides = [1, 1]} : vector<16x256xf32> to vector<16x128xf32>
    %7 = arith.negf %6 : vector<16x128xf32>
    %8 = math.exp %7 : vector<16x128xf32>
    %cst_5 = arith.constant 1.000000e+00 : f32
    %9 = vector.broadcast %cst_5 : f32 to vector<16x128xf32>
    %10 = arith.addf %9, %8 : vector<16x128xf32>
    %11 = arith.divf %9, %10 : vector<16x128xf32>
    %12 = vector.extract_strided_slice %5 {offsets = [0, 128], sizes = [16, 128], strides = [1, 1]} : vector<16x256xf32> to vector<16x128xf32>
    %cst_6 = arith.constant 0.000000e+00 : f32
    %13 = vector.broadcast %cst_6 : f32 to vector<16x128xf32>
    %14 = arith.maximumf %12, %13 : vector<16x128xf32>
    %c128_i32 = arith.constant 128 : i32
    %15 = arith.muli %arg0, %c128_i32 : i32
    %16 = tpu.assume_multiple %15, 128 : i32
    %c0_7 = arith.constant 0 : index
    %17 = arith.index_cast %16 : i32 to index
    %18 = vector.load %arg2[%c0_7, %17] : memref<16x128xf32, #tpu.memory_space<vmem>>, vector<16x128xf32>
    %19 = arith.subf %14, %18 : vector<16x128xf32>
    %20 = arith.mulf %11, %19 : vector<16x128xf32>
    %21 = arith.addf %18, %20 : vector<16x128xf32>
    %c0_8 = arith.constant 0 : index
    %c0_9 = arith.constant 0 : index
    %22 = vector.load %arg5[%c0_8, %c0_9] : memref<16x128xf32, #tpu.memory_space<vmem>>, vector<16x128xf32>
    tpu.vector_store %arg5[%c0_8, %c0_9], %21 {strides = array<i32>} : memref<16x128xf32, #tpu.memory_space<vmem>>, vector<16x128xf32>,
    return
  }
  func.func @transform_0(%arg0: i32, %arg1: i32) -> (i32, i32) {
    %c0_i32 = arith.constant 0 : i32
    %c0_i32_0 = arith.constant 0 : i32
    return %arg1, %c0_i32 : i32, i32
  }
  func.func @transform_1(%arg0: i32, %arg1: i32) -> (i32, i32) {
    %c0_i32 = arith.constant 0 : i32
    %c0_i32_0 = arith.constant 0 : i32
    return %arg0, %c0_i32 : i32, i32
  }
  func.func @transform_2(%arg0: i32, %arg1: i32) -> (i32, i32) {
    %c0_i32 = arith.constant 0 : i32
    %c0_i32_0 = arith.constant 0 : i32
    return %c0_i32, %arg0 : i32, i32
  }
  func.func @transform_3(%arg0: i32, %arg1: i32) -> (i32, i32) {
    %c0_i32 = arith.constant 0 : i32
    return %arg1, %arg0 : i32, i32
  }
}

</mosaic_0001>

<bundles_post_ra>
// kernel: tpu_custom_call.1
= control target key start
LH: loop header
LB: loop body
LE: loop exit
PB: predicated region body
PF: predicated region fallthrough
CT: control target
= control target key end

     0   :  { %8 = vsyncpa [#allocation3], 0  ;;  %s469_s0 = inlined_call_operand.hbm [shape: f32[16,128], index: 0, kind: input, shape index: {}]   ;;  %s470_s1 = inlined_call_operand.hbm [shape: f32[256,128], index: 1, kind: input, shape index: {}]   ;;  %s471_s2 = inlined_call_operand.vmem [shape: f32[1,256], index: 2, kind: input, shape index: {}]   ;;  %s472_s3 = inlined_call_operand.hbm [shape: f32[16,128], index: 3, kind: output, shape index: {}]  }
   0x1   :  { %9 = vsyncpa [#allocation6], 0 }
   0x2   :  { %10 = vsyncpa [#allocation4], 0  ;;  %s384_s12 = smov [#allocation2]   ;;  %s312_s16 = scalar_lea.hbm %s469_s0, 256 }
   0x3   :  { %s16_s13 = sshll.u32 %s384_s12, 4  ;;  %p313_p0 = scmp.ne.s32.totalorder %s469_s0, %s312_s16  ;;  %s17_s13 = int_to_ptr.vmem [resolvable:$true] %s16_s13 }
   0x4   :  { %p316_p1 = scmp.lt.u32.totalorder %s312_s16, %s469_s0 }
   0x6   :  { %p318_p2 = pnand %p316_p1, %p313_p0 }
   0x8   :  { %321 = shalt.err (!%p318_p2)
}
   0x9   :  { %s322_s21 = scalar_lea.vmem %s17_s13, 256  ;;  %p327_p4 = scmp.lt.s32.totalorder %s17_s13, %s17_s13 }
   0xa   :  { %p323_p3 = scmp.ne.s32.totalorder %s17_s13, %s322_s21  ;;  %p328_p5 = scmp.lt.s32.totalorder %s322_s21, %s322_s21 }
   0xc   :  { %p329_p6 = por %p328_p5, %p327_p4 }
   0xe   :  { %p330_p7 = pnand %p329_p6, %p323_p3 }
  0x10   :  { %333 = shalt.err (!%p330_p7)
}
  0x11   :  { %s385_s22 = smov 128   ;;  %s386_s23 = smov 8  }
  0x12   :  { %22 = dma.hbm_to_vmem [thread:$0]  %s469_s0, 256, %s17_s13, [#allocation3], %s385_s22, %s385_s22, %s386_s23  }
  0x13   :  { %s387_s26 = smov [#allocation5]   ;;  %s334_s30 = scalar_lea.hbm %s470_s1, 4096 }
  0x14   :  { %s28_s27 = sshll.u32 %s387_s26, 4  ;;  %p335_p8 = scmp.ne.s32.totalorder %s470_s1, %s334_s30  ;;  %s29_s27 = int_to_ptr.vmem [resolvable:$true] %s28_s27 }
  0x15   :  { %p338_p9 = scmp.lt.u32.totalorder %s334_s30, %s470_s1 }
  0x17   :  { %p340_p10 = pnand %p338_p9, %p335_p8 }
  0x19   :  { %343 = shalt.err (!%p340_p10)
}
  0x1a   :  { %s344_s8 = scalar_lea.vmem %s29_s27, 4096  ;;  %p349_p12 = scmp.lt.s32.totalorder %s29_s27, %s29_s27 }
  0x1b   :  { %p345_p11 = scmp.ne.s32.totalorder %s29_s27, %s344_s8  ;;  %p350_p13 = scmp.lt.s32.totalorder %s344_s8, %s344_s8 }
  0x1d   :  { %p351_p0 = por %p350_p13, %p349_p12 }
  0x1f   :  { %p352_p1 = pnand %p351_p0, %p345_p11 }
  0x21   :  { %355 = shalt.err (!%p352_p1)
}
  0x22   :  { %34 = dma.hbm_to_vmem [thread:$0]  %s470_s1, 4096, %s29_s27, [#allocation6], %s385_s22, %s385_s22, %s386_s23  }
  0x23   :  { %378 = dma.done.wait [#allocation3], 256  }
  0x24   :  { %379 = vsyncadd [#allocation3], 4294967040 }
  0x25   :  { %380 = dma.done.wait [#allocation6], 4096  }
  0x26   :  { %381 = vsyncadd [#allocation6], 4294963200  ;;  %v61_v0 = vld [vmem:[#allocation5 + $0x80] sm:$0xff]  ;;  %v62_v1 = vld [vmem:[#allocation5 + $0x88] sm:$0xff]  ;;  %v79_v50 = vlaneseq }
  0x27   :  { %v45_v2 = vld [vmem:[#allocation5] sm:$0xff]  ;;  %v251_v3 = vpack.c.bf16 %v62_v1, %v61_v0  ;;  %v46_v4 = vld [vmem:[#allocation5 + $0x8] sm:$0xff]  ;;  %v63_v5 = vld [vmem:[#allocation5 + $0x90] sm:$0xff] }
  0x28   :  { %v64_v6 = vld [vmem:[#allocation5 + $0x98] sm:$0xff]  ;;  %v253_v7 = vpack.c.bf16 %v46_v4, %v45_v2  ;;  %v47_v9 = vld [vmem:[#allocation5 + $0x10] sm:$0xff]  ;;  %v65_v11 = vld [vmem:[#allocation5 + $0xa0] sm:$0xff]  ;;  %v80_v51 = vshrl.u32 %v79_v50, 7 }
  0x29   :  { %v255_v8 = vpack.c.bf16 %v64_v6, %v63_v5  ;;  %252 = vmatprep.subr.bf16.mxu0 %v251_v3  ;;  %283 = vmatprep.subr.bf16.mxu1 %v251_v3  ;;  %v48_v10 = vld [vmem:[#allocation5 + $0x18] sm:$0xff]  ;;  %v66_v12 = vld [vmem:[#allocation5 + $0xa8] sm:$0xff]  ;;  %v439_v15 = vld [vmem:[#allocation2] sm:$0xff] }
  0x2a   :  { %254 = vmatpush3.bf16.xpose.msra.mxu0 %v253_v7  ;;  %291 = vmatpush3.bf16.xpose.msra.mxu1 %v253_v7  ;;  %v257_v13 = vpack.c.bf16 %v48_v10, %v47_v9  ;;  %v259_v14 = vpack.c.bf16 %v66_v12, %v65_v11  ;;  %v442_v16 = vld [vmem:[#allocation2 + $0x8] sm:$0xff]  ;;  %v49_v17 = vld [vmem:[#allocation5 + $0x20] sm:$0xff]  ;;  %v50_v18 = vld [vmem:[#allocation5 + $0x28] sm:$0xff]  ;;  %v81_v52 = vsub.s32 0, %v80_v51  ;;  %v85_v63 = vsub.s32 1, %v80_v51 }
  0x2b   :  { %256 = vmatprep.subr.bf16.mxu0 %v255_v8  ;;  %284 = vmatprep.subr.bf16.mxu1 %v255_v8  ;;  %v67_v19 = vld [vmem:[#allocation5 + $0xb0] sm:$0xff]  ;;  %v68_v20 = vld [vmem:[#allocation5 + $0xb8] sm:$0xff]  ;;  %v261_v21 = vpack.c.bf16 %v50_v18, %v49_v17  ;;  %v69_v25 = vld [vmem:[#allocation5 + $0xc0] sm:$0xff] }
  0x2c   :  { %247 = vmatprep.mubr.f32.mxu0 %v439_v15  ;;  %249 = vmatprep.mubr.f32.mxu1 %v442_v16  ;;  %v263_v22 = vpack.c.bf16 %v68_v20, %v67_v19  ;;  %v51_v23 = vld [vmem:[#allocation5 + $0x30] sm:$0xff]  ;;  %v52_v24 = vld [vmem:[#allocation5 + $0x38] sm:$0xff]  ;;  %v70_v26 = vld [vmem:[#allocation5 + $0xc8] sm:$0xff] }
  0x2d   :  { %v265_v27 = vpack.c.bf16 %v52_v24, %v51_v23  ;;  %v267_v28 = vpack.c.bf16 %v70_v26, %v69_v25  ;;  %v53_v29 = vld [vmem:[#allocation5 + $0x40] sm:$0xff]  ;;  %v54_v30 = vld [vmem:[#allocation5 + $0x48] sm:$0xff]  ;;  %v71_v31 = vld [vmem:[#allocation5 + $0xd0] sm:$0xff] }
  0x2e   :  { %v72_v32 = vld [vmem:[#allocation5 + $0xd8] sm:$0xff]  ;;  %v269_v33 = vpack.c.bf16 %v54_v30, %v53_v29  ;;  %v55_v35 = vld [vmem:[#allocation5 + $0x50] sm:$0xff]  ;;  %v73_v37 = vld [vmem:[#allocation5 + $0xe0] sm:$0xff] }
  0x2f   :  { %v271_v34 = vpack.c.bf16 %v72_v32, %v71_v31  ;;  %v56_v36 = vld [vmem:[#allocation5 + $0x58] sm:$0xff]  ;;  %v74_v38 = vld [vmem:[#allocation5 + $0xe8] sm:$0xff]  ;;  %v57_v41 = vld [vmem:[#allocation5 + $0x60] sm:$0xff] }
  0x30   :  { %v273_v39 = vpack.c.bf16 %v56_v36, %v55_v35  ;;  %v275_v40 = vpack.c.bf16 %v74_v38, %v73_v37  ;;  %v58_v42 = vld [vmem:[#allocation5 + $0x68] sm:$0xff]  ;;  %v75_v43 = vld [vmem:[#allocation5 + $0xf0] sm:$0xff]  ;;  %v76_v44 = vld [vmem:[#allocation5 + $0xf8] sm:$0xff] }
  0x31   :  { %v277_v45 = vpack.c.bf16 %v58_v42, %v57_v41  ;;  %v279_v46 = vpack.c.bf16 %v76_v44, %v75_v43  ;;  %v59_v47 = vld [vmem:[#allocation5 + $0x70] sm:$0xff]  ;;  %v60_v48 = vld [vmem:[#allocation5 + $0x78] sm:$0xff] }
  0x32   :  { %258 = vmatpush3.bf16.xpose.msra.mxu0 %v257_v13  ;;  %292 = vmatpush3.bf16.xpose.msra.mxu1 %v257_v13  ;;  %v281_v49 = vpack.c.bf16 %v60_v48, %v59_v47  ;;  %v77_v53 = vld [vmem:[%s471_s2] sm:$0x3]  ;;  %s388_s2 = smov [#allocation7]  }
  0x33   :  { %260 = vmatprep.subr.bf16.mxu0 %v259_v14  ;;  %285 = vmatprep.subr.bf16.mxu1 %v259_v14  ;;  %v82_v54 = vrot.slane %v77_v53, %v81_v52  ;;  %v86_v1 = vrot.slane %v77_v53, %v85_v63  ;;  %s199_s11 = sshll.u32 %s388_s2, 4  ;;  %s200_s11 = int_to_ptr.vmem [resolvable:$true] %s199_s11 }
  0x34   :  { %s356_s12 = scalar_lea.vmem %s200_s11, 256  ;;  %p361_p3 = scmp.lt.s32.totalorder %s200_s11, %s200_s11 }
  0x35   :  { %p357_p2 = scmp.ne.s32.totalorder %s200_s11, %s356_s12  ;;  %p362_p4 = scmp.lt.s32.totalorder %s356_s12, %s356_s12 }
  0x37   :  { %p363_p5 = por %p362_p4, %p361_p3 }
  0x39   :  { %p364_p6 = pnand %p363_p5, %p357_p2 }
  0x3a   :  { %262 = vmatpush3.bf16.xpose.msra.mxu0 %v261_v21  ;;  %293 = vmatpush3.bf16.xpose.msra.mxu1 %v261_v21 }
  0x3b   :  { %264 = vmatprep.subr.bf16.mxu0 %v263_v22  ;;  %286 = vmatprep.subr.bf16.mxu1 %v263_v22 }
  0x42   :  { %266 = vmatpush3.bf16.xpose.msra.mxu0 %v265_v27  ;;  %294 = vmatpush3.bf16.xpose.msra.mxu1 %v265_v27 }
  0x43   :  { %268 = vmatprep.subr.bf16.mxu0 %v267_v28  ;;  %287 = vmatprep.subr.bf16.mxu1 %v267_v28 }
  0x4a   :  { %270 = vmatpush3.bf16.xpose.msra.mxu0 %v269_v33  ;;  %295 = vmatpush3.bf16.xpose.msra.mxu1 %v269_v33 }
  0x4b   :  { %272 = vmatprep.subr.bf16.mxu0 %v271_v34  ;;  %288 = vmatprep.subr.bf16.mxu1 %v271_v34 }
  0x52   :  { %274 = vmatpush3.bf16.xpose.msra.mxu0 %v273_v39  ;;  %296 = vmatpush3.bf16.xpose.msra.mxu1 %v273_v39 }
  0x53   :  { %276 = vmatprep.subr.bf16.mxu0 %v275_v40  ;;  %289 = vmatprep.subr.bf16.mxu1 %v275_v40 }
  0x5a   :  { %278 = vmatpush3.bf16.xpose.msra.mxu0 %v277_v45  ;;  %297 = vmatpush3.bf16.xpose.msra.mxu1 %v277_v45 }
  0x5b   :  { %280 = vmatprep.subr.bf16.mxu0 %v279_v46  ;;  %290 = vmatprep.subr.bf16.mxu1 %v279_v46 }
  0x62   :  { %282 = vmatpush3.bf16.xpose.msra.mxu0 %v281_v49  ;;  %298 = vmatpush3.bf16.xpose.msra.mxu1 %v281_v49 }
  0x69   :  { %248 = vmatmul.mubr.f32.vlgmr.msra.gmra.mrb[0].mxu0 %v439_v15  ;;  %250 = vmatmul.mubr.f32.vlgmr.msra.gmra.mrb[0].mxu1 %v442_v16 }
 0x13c   :  { %v155_v55 = vpop.f32.mrb[0].mxu0  ;;  %v161_v56 = vpop.f32.mrb[0].mxu1 }
 0x13d   :  { %v156_v57 = vadd.f32 %v155_v55, %v82_v54  ;;  %v162_v58 = vadd.f32 %v161_v56, %v82_v54  ;;  %v157_v59 = vpop.f32.mrb[1].mxu0  ;;  %v163_v60 = vpop.f32.mrb[1].mxu1 }
 0x13e   :  { %v158_v5 = vadd.f32 %v157_v59, %v86_v1  ;;  %v164_v6 = vadd.f32 %v163_v60, %v86_v1 }
 0x13f   :  { %v213_v61 = vmul.f32 -1.442695, %v156_v57  ;;  %v214_v62 = vmul.f32 -1.442695, %v162_v58 }
 0x140   :  { %v178_v7 = vmax.f32 %v158_v5, 0.0  ;;  %v179_v8 = vmax.f32 %v164_v6, 0.0 }
 0x141   :  { %304 = vpow2.f32 %v213_v61 }
 0x142   :  { %306 = vpow2.f32 %v214_v62  ;;  %v186_v9 = vsub.f32 %v178_v7, %v439_v15  ;;  %v187_v11 = vsub.f32 %v179_v8, %v442_v16 }
 0x14b   :  { %v305_v0 = vpop.eup %304 }
 0x14c   :  { %v307_v2 = vpop.eup %306  ;;  %v172_v3 = vadd.f32 1.0, %v305_v0 }
 0x14d   :  { %v173_v4 = vadd.f32 1.0, %v307_v2 }
 0x14e   :  { %308 = vrcp.f32 %v172_v3 }
 0x14f   :  { %310 = vrcp.f32 %v173_v4 }
 0x158   :  { %v309_v10 = vpop.eup %308 }
 0x159   :  { %v311_v12 = vpop.eup %310  ;;  %v188_v13 = vmul.f32 %v309_v10, %v186_v9 }
 0x15a   :  { %v189_v14 = vmul.f32 %v311_v12, %v187_v11 }
 0x15b   :  { %v190_v17 = vadd.f32 %v188_v13, %v439_v15 }
 0x15c   :  { %v191_v18 = vadd.f32 %v189_v14, %v442_v16 }
 0x15d   :  { %192 = vst [vmem:[#allocation7] sm:$0xff] %v190_v17 }
 0x15e   :  { %193 = vst [vmem:[#allocation7 + $0x8] sm:$0xff] %v191_v18 }
 0x15f   :  { %367 = shalt.err (!%p364_p6)
}
 0x160   :  { %s368_s15 = scalar_lea.hbm %s472_s3, 256 }
 0x161   :  { %p369_p7 = scmp.ne.s32.totalorder %s472_s3, %s368_s15  ;;  %p372_p8 = scmp.lt.u32.totalorder %s368_s15, %s472_s3 }
 0x163   :  { %p374_p9 = pnand %p372_p8, %p369_p7 }
 0x165   :  { %377 = shalt.err (!%p374_p9)
}
 0x166   :  { %205 = dma.vmem_to_hbm [thread:$0]  %s200_s11, 256, %s472_s3, [#allocation4], %s385_s22, %s385_s22, %s386_s23  }
 0x167   :  { %382 = dma.done.wait [#allocation4], 256  }
 0x168   :  { %383 = vsyncadd [#allocation4], 4294967040 }
 0x169   :  { %209 = vsyncpa [#allocation3], 1 }
 0x16a   :  { %210 = vsyncpa [#allocation6], 1 }
 0x16b   :  { %211 = vsyncpa [#allocation4], 1 }

</bundles_post_ra>
